<compile_context>
chip_gen: v7x
topology: tpu7x:2x2x1
jax: 0.10.0
libtpu: 0.0.40
codegen_flags: <defaults>
</compile_context>

<pallas_src>
import functools

import jax
import jax.numpy as jnp
from jax.experimental import pallas as pl
from jax.experimental.pallas import tpu as pltpu


_VMEM_LIMIT = 48 * 1024 * 1024  # fits v7x's 64 MiB/TC with headroom; raises
                                # the 16/32 MiB default scope on v5e/v6e.


# ----------------------------------------------------------------------------
# tile helper: largest multiple of `align` <= desired that divides dim,
# else fall back to the full dim (no tiling along that axis).
# ----------------------------------------------------------------------------
def _pick_tile(dim, desired, align):
    if dim <= desired:
        return dim
    t = (desired // align) * align
    while t >= align:
        if dim % t == 0:
            return t
        t -= align
    return dim


# ----------------------------------------------------------------------------
# Kernel 1: tiled GEMM with f32 accumulator; optional fused bias epilogue.
#   y = x @ w (+ bias)   with x:(M,K), w:(K,N), bias:(1,N)
# ----------------------------------------------------------------------------
def _gemm_body(x_ref, w_ref, o_ref, acc_ref, bias_ref=None):
    @pl.when(pl.program_id(2) == 0)
    def _():
        acc_ref[...] = jnp.zeros_like(acc_ref)

    acc_ref[...] += jnp.dot(
        x_ref[...], w_ref[...], preferred_element_type=jnp.float32
    )

    @pl.when(pl.program_id(2) == pl.num_programs(2) - 1)
    def _():
        acc = acc_ref[...]
        if bias_ref is not None:
            acc = acc + bias_ref[...]  # (1, tn) broadcasts over the tm rows
        o_ref[...] = acc.astype(o_ref.dtype)


def _gemm_kernel(x_ref, w_ref, o_ref, acc_ref):
    _gemm_body(x_ref, w_ref, o_ref, acc_ref)


def _gemm_bias_kernel(x_ref, w_ref, b_ref, o_ref, acc_ref):
    _gemm_body(x_ref, w_ref, o_ref, acc_ref, bias_ref=b_ref)


def linear(x2d, w, bias=None, *, tm=256, tn=256, tk=512):
    M, K = x2d.shape
    K2, N = w.shape
    assert K == K2
    # NOTE: on v7x (64 MiB VMEM/TC) halve tm/tk defaults if scaling these up.
    tm = _pick_tile(M, tm, 8)
    tn = _pick_tile(N, tn, 128)
    tk = _pick_tile(K, tk, 128)
    grid = (M // tm, N // tn, K // tk)

    in_specs = [
        pl.BlockSpec((tm, tk), lambda i, j, k: (i, k)),
        pl.BlockSpec((tk, tn), lambda i, j, k: (k, j)),
    ]
    operands = [x2d, w]
    kernel = _gemm_kernel
    if bias is not None:
        in_specs.append(pl.BlockSpec((1, tn), lambda i, j, k: (0, j)))
        operands.append(bias.reshape(1, N))
        kernel = _gemm_bias_kernel

    itemsize = x2d.dtype.itemsize
    cost = pl.CostEstimate(
        flops=2 * M * N * K,
        transcendentals=0,
        bytes_accessed=(M * K + K * N + M * N + (N if bias is not None else 0))
        * itemsize,
    )

    return pl.pallas_call(
        kernel,
        out_shape=jax.ShapeDtypeStruct((M, N), x2d.dtype),
        grid=grid,
        in_specs=in_specs,
        out_specs=pl.BlockSpec((tm, tn), lambda i, j, k: (i, j)),
        scratch_shapes=[pltpu.VMEM((tm, tn), jnp.float32)],
        compiler_params=pltpu.CompilerParams(
            dimension_semantics=("parallel", "parallel", "arbitrary"),
            vmem_limit_bytes=_VMEM_LIMIT,
        ),
        cost_estimate=cost,
    )(*operands)


# ----------------------------------------------------------------------------
# Kernel 2: per-batch-element self-attention over all heads.
# w stays in its natural (B, N, H*D) layout; heads are sliced in VMEM.
#   per head: dots = (w_h * scale) @ w_h^T ; attn = softmax(dots) ; out = attn @ w_h
# Output is stored lane-dense as one (N, H*D) block per grid step.
# ----------------------------------------------------------------------------
def _attention_kernel(w_ref, o_ref, *, scale, heads, dim_head):
    w = w_ref[...]  # (N, H*D)
    outs = []
    for h in range(heads):
        wg = w[:, h * dim_head:(h + 1) * dim_head]  # (N, D)
        # scale folded into one matmul operand: O(N*D) work instead of O(N^2)
        dots = jnp.dot(wg * scale, wg.T, preferred_element_type=jnp.float32)
        dots = dots - jnp.max(dots, axis=-1, keepdims=True)
        e = jnp.exp(dots)
        denom = jnp.sum(e, axis=-1, keepdims=True)
        attn = e * pl.reciprocal(denom, approx=True)  # EUP slot, ~free
        outs.append(
            jnp.dot(attn.astype(wg.dtype), wg, preferred_element_type=jnp.float32)
        )
    # single lane-dense (N, H*D) store
    o_ref[...] = jnp.concatenate(outs, axis=-1).astype(o_ref.dtype)


def attention_core(w_bnf, scale, *, heads, dim_head):
    # w_bnf: (B, N, H*D) -- natural post-qkv layout, no HBM transpose needed.
    B, N, F = w_bnf.shape
    assert F == heads * dim_head
    kernel = functools.partial(
        _attention_kernel, scale=scale, heads=heads, dim_head=dim_head
    )
    itemsize = w_bnf.dtype.itemsize
    cost = pl.CostEstimate(
        flops=4 * B * heads * N * N * dim_head,
        transcendentals=B * heads * N * N,
        bytes_accessed=2 * B * N * F * itemsize,
    )
    # TODO(synk): for long sequences (N >~ 1K, sooner on v7x) switch to a
    # flash-style online-softmax with a KV grid axis instead of materializing
    # the N x N score matrix per head.
    return pl.pallas_call(
        kernel,
        out_shape=jax.ShapeDtypeStruct((B, N, F), w_bnf.dtype),
        grid=(B,),
        in_specs=[pl.BlockSpec((None, N, F), lambda b: (b, 0, 0))],
        out_specs=pl.BlockSpec((None, N, F), lambda b: (b, 0, 0)),
        compiler_params=pltpu.CompilerParams(
            dimension_semantics=("parallel",),
            vmem_limit_bytes=_VMEM_LIMIT,
        ),
        cost_estimate=cost,
    )(w_bnf)


# ----------------------------------------------------------------------------
# Full forward pass (mirrors the PyTorch module; dropout p=0.0 -> identity).
# No HBM transposes: every reshape below is a free re-view of contiguous data.
# ----------------------------------------------------------------------------
def crate_attention_forward(x, params, *, heads, dim_head):
    B, N, dim = x.shape
    inner_dim = heads * dim_head
    scale = dim_head ** (-0.5)

    # qkv projection (Linear, no bias): (B*N, dim) @ (dim, inner_dim)
    w = linear(x.reshape(B * N, dim), params["qkv_w"])        # (B*N, inner)
    w = w.reshape(B, N, inner_dim)                            # free reshape

    # fused attention over all heads, output already in 'b n (h d)' order
    out = attention_core(w, scale, heads=heads, dim_head=dim_head)

    # output projection with fused bias (project_out since heads*dim_head != dim)
    y = linear(out.reshape(B * N, inner_dim), params["out_w"], params["out_b"])
    return y.reshape(B, N, dim)


# ----------------------------------------------------------------------------
# Pure-JAX reference for a sanity check
# ----------------------------------------------------------------------------
def reference_forward(x, params, *, heads, dim_head):
    B, N, dim = x.shape
    scale = dim_head ** (-0.5)
    w = x.reshape(B * N, dim) @ params["qkv_w"]
    w = w.reshape(B, N, heads, dim_head).transpose(0, 2, 1, 3)
    dots = jnp.einsum("bhnd,bhmd->bhnm", w, w) * scale
    attn = jax.nn.softmax(dots, axis=-1)
    out = jnp.einsum("bhnm,bhmd->bhnd", attn, w)
    out = out.transpose(0, 2, 1, 3).reshape(B * N, heads * dim_head)
    y = out @ params["out_w"] + params["out_b"]
    return y.reshape(B, N, dim)


if __name__ == "__main__":
    # Small, module-consistent shapes.
    B, N, dim = 2, 8, 32
    heads, dim_head = 4, 16
    inner_dim = heads * dim_head

    key = jax.random.PRNGKey(0)
    kx, kqkv, kow, kob = jax.random.split(key, 4)

    x = jax.random.normal(kx, (B, N, dim), dtype=jnp.float32)

    # PyTorch Linear stores weight as (out, in) and computes x @ W^T; we build
    # the (in, out) matrices directly.
    params = {
        "qkv_w": jax.random.normal(kqkv, (dim, inner_dim), jnp.float32)
        * (dim ** -0.5),
        "out_w": jax.random.normal(kow, (inner_dim, dim), jnp.float32)
        * (inner_dim ** -0.5),
        "out_b": jax.random.normal(kob, (dim,), jnp.float32) * 0.01,
    }

    y = crate_attention_forward(x, params, heads=heads, dim_head=dim_head)
    y = jax.block_until_ready(y)

    y_ref = reference_forward(x, params, heads=heads, dim_head=dim_head)
    assert y.shape == (B, N, dim)
    # tolerance relaxed slightly for the EUP approximate-reciprocal softmax
    assert jnp.allclose(y, y_ref, atol=2e-2, rtol=2e-2)

    print("KERNEL_OK")
</pallas_src>

<mosaic_0001>
module attributes {stable_mosaic.version = 11 : i64} {
  func.func @_gemm_kernel(%arg0: i32, %arg1: i32, %arg2: i32, %arg3: memref<16x32xf32, #tpu.memory_space<vmem>>, %arg4: memref<32x64xf32, #tpu.memory_space<vmem>>, %arg5: memref<16x64xf32, #tpu.memory_space<vmem>>, %arg6: memref<16x64xf32, #tpu.memory_space<vmem>>) attributes {dimension_semantics = [#tpu.dimension_semantics<parallel>, #tpu.dimension_semantics<parallel>, #tpu.dimension_semantics<arbitrary>], iteration_bounds = array<i64: 1, 1, 1>, scalar_prefetch = 0 : i64, scratch_operands = 1 : i64, tpu.core_type = #tpu.core_type<tc>, window_params = [{transform_indices = @transform_0, window_bounds = array<i64: 16, 32>}, {transform_indices = @transform_1, window_bounds = array<i64: 32, 64>}, {transform_indices = @transform_2, window_bounds = array<i64: 16, 64>}]} {
    %c0_i32 = arith.constant 0 : i32
    %0 = arith.cmpi eq, %arg2, %c0_i32 : i32
    %1 = arith.extui %0 : i1 to i32
    %c0_i32_0 = arith.constant 0 : i32
    %2 = arith.cmpi ne, %1, %c0_i32_0 : i32
    scf.if %2 {
      %cst_10 = arith.constant 0.000000e+00 : f32
      %12 = vector.broadcast %cst_10 : f32 to vector<16x64xf32>
      %c0_11 = arith.constant 0 : index
      %c0_12 = arith.constant 0 : index
      %13 = vector.load %arg6[%c0_11, %c0_12] : memref<16x64xf32, #tpu.memory_space<vmem>>, vector<16x64xf32>
      tpu.vector_store %arg6[%c0_11, %c0_12], %12 {strides = array<i32>} : memref<16x64xf32, #tpu.memory_space<vmem>>, vector<16x64xf32>,
    } else {
    }
    %c0 = arith.constant 0 : index
    %c0_1 = arith.constant 0 : index
    %3 = vector.load %arg6[%c0, %c0_1] : memref<16x64xf32, #tpu.memory_space<vmem>>, vector<16x64xf32>
    %c0_2 = arith.constant 0 : index
    %c0_3 = arith.constant 0 : index
    %4 = vector.load %arg3[%c0_2, %c0_3] : memref<16x32xf32, #tpu.memory_space<vmem>>, vector<16x32xf32>
    %c0_4 = arith.constant 0 : index
    %c0_5 = arith.constant 0 : index
    %5 = vector.load %arg4[%c0_4, %c0_5] : memref<32x64xf32, #tpu.memory_space<vmem>>, vector<32x64xf32>
    %cst = arith.constant dense<0.000000e+00> : vector<16x64xf32>
    %6 = tpu.matmul %4, %5, %cst {dimension_numbers = #tpu.dot_dimension_numbers<[1], [0], [0], [1], [0, 0, 1, 1], [], []>} : vector<16x32xf32>, vector<32x64xf32>, vector<16x64xf32> -> vector<16x64xf32>
    %7 = arith.addf %3, %6 : vector<16x64xf32>
    %c0_6 = arith.constant 0 : index
    %c0_7 = arith.constant 0 : index
    %8 = vector.load %arg6[%c0_6, %c0_7] : memref<16x64xf32, #tpu.memory_space<vmem>>, vector<16x64xf32>
    tpu.vector_store %arg6[%c0_6, %c0_7], %7 {strides = array<i32>} : memref<16x64xf32, #tpu.memory_space<vmem>>, vector<16x64xf32>,
    %c0_i32_8 = arith.constant 0 : i32
    %9 = arith.cmpi eq, %arg2, %c0_i32_8 : i32
    %10 = arith.extui %9 : i1 to i32
    %c0_i32_9 = arith.constant 0 : i32
    %11 = arith.cmpi ne, %10, %c0_i32_9 : i32
    scf.if %11 {
      %c0_10 = arith.constant 0 : index
      %c0_11 = arith.constant 0 : index
      %12 = vector.load %arg6[%c0_10, %c0_11] : memref<16x64xf32, #tpu.memory_space<vmem>>, vector<16x64xf32>
      %c0_12 = arith.constant 0 : index
      %c0_13 = arith.constant 0 : index
      %13 = vector.load %arg5[%c0_12, %c0_13] : memref<16x64xf32, #tpu.memory_space<vmem>>, vector<16x64xf32>
      tpu.vector_store %arg5[%c0_12, %c0_13], %12 {strides = array<i32>} : memref<16x64xf32, #tpu.memory_space<vmem>>, vector<16x64xf32>,
    } else {
    }
    return
  }
  func.func @transform_0(%arg0: i32, %arg1: i32, %arg2: i32) -> (i32, i32) {
    %c0_i32 = arith.constant 0 : i32
    return %arg0, %arg2 : i32, i32
  }
  func.func @transform_1(%arg0: i32, %arg1: i32, %arg2: i32) -> (i32, i32) {
    %c0_i32 = arith.constant 0 : i32
    return %arg2, %arg1 : i32, i32
  }
  func.func @transform_2(%arg0: i32, %arg1: i32, %arg2: i32) -> (i32, i32) {
    %c0_i32 = arith.constant 0 : i32
    return %arg0, %arg1 : i32, i32
  }
}

</mosaic_0001>

<bundles_post_ra>
// kernel: tpu_custom_call.1
= control target key start
LH: loop header
LB: loop body
LE: loop exit
PB: predicated region body
PF: predicated region fallthrough
CT: control target
= control target key end

     0   :  { %7 = vsyncpa [#allocation4], 0  ;;  %s344_s0 = inlined_call_operand.hbm [shape: f32[16,32], index: 0, kind: input, shape index: {}]   ;;  %s345_s1 = inlined_call_operand.hbm [shape: f32[32,64], index: 1, kind: input, shape index: {}]   ;;  %s346_s2 = inlined_call_operand.hbm [shape: f32[16,64], index: 2, kind: output, shape index: {}]  }
   0x1   :  { %8 = vsyncpa [#allocation7], 0 }
   0x2   :  { %9 = vsyncpa [#allocation5], 0  ;;  %s272_s9 = smov [#allocation3]   ;;  %s200_s13 = scalar_lea.hbm %s344_s0, 256 }
   0x3   :  { %s15_s10 = sshll.u32 %s272_s9, 4  ;;  %p201_p0 = scmp.ne.s32.totalorder %s344_s0, %s200_s13  ;;  %s16_s10 = int_to_ptr.vmem [resolvable:$true] %s15_s10 }
   0x4   :  { %p204_p1 = scmp.lt.u32.totalorder %s200_s13, %s344_s0 }
   0x6   :  { %p206_p2 = pnand %p204_p1, %p201_p0 }
   0x8   :  { %209 = shalt.err (!%p206_p2)
}
   0x9   :  { %s210_s18 = scalar_lea.vmem %s16_s10, 256  ;;  %p215_p4 = scmp.lt.s32.totalorder %s16_s10, %s16_s10 }
   0xa   :  { %p211_p3 = scmp.ne.s32.totalorder %s16_s10, %s210_s18  ;;  %p216_p5 = scmp.lt.s32.totalorder %s210_s18, %s210_s18 }
   0xc   :  { %p217_p6 = por %p216_p5, %p215_p4 }
   0xe   :  { %p218_p7 = pnand %p217_p6, %p211_p3 }
  0x10   :  { %221 = shalt.err (!%p218_p7)
}
  0x11   :  { %s273_s19 = smov 128   ;;  %s274_s20 = smov 8  }
  0x12   :  { %21 = dma.hbm_to_vmem [thread:$0]  %s344_s0, 256, %s16_s10, [#allocation4], %s273_s19, %s273_s19, %s274_s20  }
  0x13   :  { %s275_s23 = smov [#allocation6]   ;;  %s222_s27 = scalar_lea.hbm %s345_s1, 512 }
  0x14   :  { %s27_s24 = sshll.u32 %s275_s23, 4  ;;  %p223_p8 = scmp.ne.s32.totalorder %s345_s1, %s222_s27  ;;  %s28_s24 = int_to_ptr.vmem [resolvable:$true] %s27_s24 }
  0x15   :  { %p226_p9 = scmp.lt.u32.totalorder %s222_s27, %s345_s1 }
  0x17   :  { %p228_p10 = pnand %p226_p9, %p223_p8 }
  0x19   :  { %231 = shalt.err (!%p228_p10)
}
  0x1a   :  { %s232_s4 = scalar_lea.vmem %s28_s24, 512  ;;  %p237_p12 = scmp.lt.s32.totalorder %s28_s24, %s28_s24 }
  0x1b   :  { %p233_p11 = scmp.ne.s32.totalorder %s28_s24, %s232_s4  ;;  %p238_p13 = scmp.lt.s32.totalorder %s232_s4, %s232_s4 }
  0x1d   :  { %p239_p0 = por %p238_p13, %p237_p12 }
  0x1f   :  { %p240_p1 = pnand %p239_p0, %p233_p11 }
  0x21   :  { %243 = shalt.err (!%p240_p1)
}
  0x22   :  { %33 = dma.hbm_to_vmem [thread:$0]  %s345_s1, 512, %s28_s24, [#allocation7], %s273_s19, %s273_s19, %s274_s20  }
  0x23   :  { %266 = dma.done.wait [#allocation4], 256  }
  0x24   :  { %267 = vsyncadd [#allocation4], 4294967040 }
  0x25   :  { %268 = dma.done.wait [#allocation7], 512  }
  0x26   :  { %269 = vsyncadd [#allocation7], 4294966784  ;;  %vm44_vm0 = vcmask 523264   ;;  %v276_v0 = vmov 0.0   ;;  %vm55_vm1 = vcmask 261120   ;;  %v51_v1 = vld [vmem:[#allocation6] sm:$0xff] }
  0x27   :  { %46 = vst.msk [vmem:[#allocation2 + $0x8] sm:$0xff] %vm44_vm0, %v276_v0  ;;  %45 = vst.msk [vmem:[#allocation2] sm:$0xff] %vm44_vm0, %v276_v0  ;;  %v52_v2 = vld [vmem:[#allocation6 + $0x8] sm:$0xff]  ;;  %v53_v3 = vld [vmem:[#allocation6 + $0x10] sm:$0xff]  ;;  %s277_s1 = smov [#allocation8]  }
  0x28   :  { %v186_v4 = vpack.c.bf16 %v52_v2, %v51_v1  ;;  %v54_v5 = vld [vmem:[#allocation6 + $0x18] sm:$0xff]  ;;  %v49_v6 = vld [vmem:[#allocation3] sm:$0xff]  ;;  %s154_s6 = sshll.u32 %s277_s1, 4  ;;  %s155_s6 = int_to_ptr.vmem [resolvable:$true] %s154_s6 }
  0x29   :  { %v190_v7 = vpack.c.bf16 %v54_v5, %v53_v3  ;;  %183 = vmatprep.mubr.msk.f32.mxu0 %vm55_vm1, %v49_v6  ;;  %v50_v8 = vld [vmem:[#allocation3 + $0x8] sm:$0xff]  ;;  %s244_s7 = scalar_lea.vmem %s155_s6, 256  ;;  %p249_p3 = scmp.lt.s32.totalorder %s155_s6, %s155_s6 }
  0x2a   :  { %187 = vmatprep.subr.bf16.mxu0 %v186_v4  ;;  %p245_p2 = scmp.ne.s32.totalorder %s155_s6, %s244_s7  ;;  %p250_p4 = scmp.lt.s32.totalorder %s244_s7, %s244_s7 }
  0x2b   :  { %189 = vmatpush3.bf16.msra.mxu0 %v186_v4 }
  0x2c   :  { %191 = vmatprep.subr.bf16.mxu0 %v190_v7  ;;  %p251_p5 = por %p250_p4, %p249_p3 }
  0x2e   :  { %v48_v9 = vld [vmem:[#allocation2 + $0x8] sm:$0xff]  ;;  %v47_v10 = vld [vmem:[#allocation2] sm:$0xff]  ;;  %p252_p6 = pnand %p251_p5, %p245_p2 }
  0x2f   :  { %193 = vmatpush3.bf16.msra.mxu0 %v190_v7 }
  0x32   :  { %184 = vmatmul.mubr.msk.f32.vlgmr.msra.gmra.mrb[0].mxu0 %vm55_vm1, %v50_v8 }
 0x105   :  { %v185_v11 = vpop.f32.mrb[0].mxu0 }
 0x106   :  { %v138_v12 = vadd.f32 %v185_v11, %v48_v9  ;;  %v128_v13 = vpop.f32.mrb[1].mxu0 }
 0x107   :  { %v137_v14 = vadd.f32 %v128_v13, %v47_v10 }
 0x108   :  { %141 = vst.msk [vmem:[#allocation2 + $0x8] sm:$0xff] %vm44_vm0, %v138_v12 }
 0x109   :  { %140 = vst.msk [vmem:[#allocation2] sm:$0xff] %vm44_vm0, %v137_v14 }
 0x10f   :  { %v146_v15 = vld [vmem:[#allocation2 + $0x8] sm:$0xff] }
 0x110   :  { %v145_v16 = vld [vmem:[#allocation2] sm:$0xff]  ;;  %148 = vst.msk [vmem:[#allocation8 + $0x8] sm:$0xff] %vm44_vm0, %v146_v15 }
 0x111   :  { %147 = vst.msk [vmem:[#allocation8] sm:$0xff] %vm44_vm0, %v145_v16 }
 0x112   :  { %255 = shalt.err (!%p252_p6)
}
 0x113   :  { %s256_s10 = scalar_lea.hbm %s346_s2, 256 }
 0x114   :  { %p257_p7 = scmp.ne.s32.totalorder %s346_s2, %s256_s10  ;;  %p260_p8 = scmp.lt.u32.totalorder %s256_s10, %s346_s2 }
 0x116   :  { %p262_p9 = pnand %p260_p8, %p257_p7 }
 0x118   :  { %265 = shalt.err (!%p262_p9)
}
 0x119   :  { %160 = dma.vmem_to_hbm [thread:$0]  %s155_s6, 256, %s346_s2, [#allocation5], %s273_s19, %s273_s19, %s274_s20  }
 0x11a   :  { %270 = dma.done.wait [#allocation5], 256  }
 0x11b   :  { %271 = vsyncadd [#allocation5], 4294967040 }
 0x11c   :  { %164 = vsyncpa [#allocation4], 1 }
 0x11d   :  { %165 = vsyncpa [#allocation7], 1 }
 0x11e   :  { %166 = vsyncpa [#allocation5], 1 }

</bundles_post_ra>
